<compile_context>
chip_gen: v7x
topology: tpu7x:2x2x1
jax: 0.10.0
libtpu: 0.0.40
codegen_flags: <defaults>
</compile_context>

<pallas_src>
import jax
import jax.numpy as jnp
from jax import lax
from jax.experimental import pallas as pl
from jax.experimental.pallas import tpu as pltpu


_TRANS_B_DIMS = (((1,), (1,)), ((), ()))   # contract last dims: x @ w.T


def _round_up(a, b):
    return (a + b - 1) // b * b


def _l1ra_kernel_fullk(x_ref, w_ref, xa_ref, bt_ref, bias_ref, o_ref):
    """2-D grid (i over M, j over N); the whole K reduction fits in one block."""
    base = lax.dot_general(x_ref[...], w_ref[...], _TRANS_B_DIMS,
                           preferred_element_type=jnp.float32)          # (tm, tn)
    base = base + bias_ref[...].astype(jnp.float32)
    lora = jnp.dot(xa_ref[...], bt_ref[...],
                   preferred_element_type=jnp.float32)                  # (tm, tn)
    # `result += output`: round base and LoRA separately, add in output dtype.
    o_ref[...] = base.astype(o_ref.dtype) + lora.astype(o_ref.dtype)


def _l1ra_kernel_ksplit(x_ref, w_ref, xa_ref, bt_ref, bias_ref, o_ref, acc_ref):
    """3-D grid (i over M, j over N, k over K); K is the innermost reduction axis."""
    k = pl.program_id(2)

    @pl.when(k == 0)
    def _():
        # Bias folded into the accumulator init (shortens the last-iteration epilogue).
        acc_ref[...] = jnp.broadcast_to(bias_ref[...].astype(jnp.float32),
                                        acc_ref.shape)

    acc_ref[...] += lax.dot_general(x_ref[...], w_ref[...], _TRANS_B_DIMS,
                                    preferred_element_type=jnp.float32)  # (tm, tn)

    @pl.when(k == pl.num_programs(2) - 1)
    def _():
        lora = jnp.dot(xa_ref[...], bt_ref[...],
                       preferred_element_type=jnp.float32)
        o_ref[...] = acc_ref[...].astype(o_ref.dtype) + lora.astype(o_ref.dtype)


def l1ra_quant_linear(x, w, bias, lora_A, lora_B, lora_c, *,
                      lora_alpha, r, tm=256, tn=256, tk_max=2048,
                      vmem_budget_bytes=24 * 1024 * 1024,
                      vmem_limit_bytes=48 * 1024 * 1024):
    """x: (..., K)  w: (N, K)  bias: (N,)  lora_A: (r, K)  lora_B: (N, r)  lora_c: (r, 1)."""
    orig_shape = x.shape
    K = orig_shape[-1]
    N = w.shape[0]
    rdim = lora_A.shape[0]
    out_dtype = x.dtype

    x2d = x.reshape(-1, K)
    M = x2d.shape[0]

    # ---- LoRA prep: fold `scaling / r` into B.T, hoist the rank-r A projection ----
    scaling = lora_alpha / r
    lora_scale = float(scaling) / r                       # forward applies "* scaling / r"
    act = (lora_A.astype(jnp.float32) * lora_c.astype(jnp.float32)
           ).astype(jnp.bfloat16)                                           # (r, K)
    bt = (jnp.transpose(lora_B).astype(jnp.float32) * lora_scale
          ).astype(jnp.bfloat16)                                            # (r, N)
    # xa depends only on (M, r): compute once here instead of per (i, j, k) grid step.
    xa = lax.dot_general(x2d.astype(jnp.bfloat16), act, _TRANS_B_DIMS,
                         preferred_element_type=jnp.float32
                         ).astype(jnp.bfloat16)                             # (M, r)
    bias2d = bias.reshape(1, N)

    # ---- tile selection ----
    tm = min(tm, _round_up(M, 8))              # small-M inference: one i-tile covers M
    Mp = _round_up(M, tm)
    tn = min(tn, _round_up(N, 128))
    Np = _round_up(N, tn)
    # Keep >= 2 parallel output tiles when possible so both v7x TensorCores are fed.
    if (Mp // tm) * (Np // tn) < 2 and N > 128:
        tn = _round_up(-(-N // 2), 128)
        Np = _round_up(N, tn)

    x_b = jnp.dtype(x.dtype).itemsize
    w_b = jnp.dtype(w.dtype).itemsize
    o_b = jnp.dtype(out_dtype).itemsize

    def _working_set_bytes(tk_):
        ws = 2 * tm * tk_ * x_b                      # x tile (double-buffered)
        ws += 2 * tn * tk_ * w_b                     # weight tile
        ws += 2 * tm * tn * o_b                      # output tile
        ws += tm * tn * 4                            # f32 accumulator (worst case)
        ws += 2 * (tm * 128 + 128 * tn) * 2          # xa / bt tiles (lane/sublane padded)
        ws += 2 * tn * 4                             # bias tile
        return ws

    tk = min(tk_max, _round_up(K, 128))
    while tk > 128 and _working_set_bytes(tk) > vmem_budget_bytes:
        tk = _round_up(tk // 2, 128)
    Kp = _round_up(K, tk)
    nk = Kp // tk

    # ---- zero-pad to tile multiples (padded rows/cols/k contribute nothing) ----
    # NOTE: in a real deployment the padded weight would be prepared once and cached.
    if (Mp, Kp) != (M, K):
        x2d = jnp.pad(x2d, ((0, Mp - M), (0, Kp - K)))
    if (Np, Kp) != (N, K):
        w = jnp.pad(w, ((0, Np - N), (0, Kp - K)))
    if Mp != M:
        xa = jnp.pad(xa, ((0, Mp - M), (0, 0)))
    if Np != N:
        bt = jnp.pad(bt, ((0, 0), (0, Np - N)))
        bias2d = jnp.pad(bias2d, ((0, 0), (0, Np - N)))

    if nk == 1:
        # Whole K fits in VMEM: 2-D grid, no accumulator scratch, direct write.
        out = pl.pallas_call(
            _l1ra_kernel_fullk,
            out_shape=jax.ShapeDtypeStruct((Mp, Np), out_dtype),
            grid_spec=pltpu.PrefetchScalarGridSpec(
                num_scalar_prefetch=0,
                grid=(Mp // tm, Np // tn),
                in_specs=[
                    pl.BlockSpec((tm, Kp), lambda i, j: (i, 0)),       # x tile
                    pl.BlockSpec((tn, Kp), lambda i, j: (j, 0)),       # W (N, K) tile
                    pl.BlockSpec((tm, rdim), lambda i, j: (i, 0)),     # xa tile (bf16)
                    pl.BlockSpec((rdim, tn), lambda i, j: (0, j)),     # scaled B.T tile
                    pl.BlockSpec((1, tn), lambda i, j: (0, j)),        # bias tile
                ],
                out_specs=pl.BlockSpec((tm, tn), lambda i, j: (i, j)),
            ),
            compiler_params=pltpu.CompilerParams(
                dimension_semantics=("parallel", "parallel"),
                vmem_limit_bytes=vmem_limit_bytes),
        )(x2d, w, xa, bt, bias2d)
    else:
        out = pl.pallas_call(
            _l1ra_kernel_ksplit,
            out_shape=jax.ShapeDtypeStruct((Mp, Np), out_dtype),
            grid_spec=pltpu.PrefetchScalarGridSpec(
                num_scalar_prefetch=0,
                grid=(Mp // tm, Np // tn, nk),
                in_specs=[
                    pl.BlockSpec((tm, tk), lambda i, j, k: (i, k)),    # x tile
                    pl.BlockSpec((tn, tk), lambda i, j, k: (j, k)),    # W (N, K) tile
                    pl.BlockSpec((tm, rdim), lambda i, j, k: (i, 0)),  # xa tile (bf16)
                    pl.BlockSpec((rdim, tn), lambda i, j, k: (0, j)),  # scaled B.T tile
                    pl.BlockSpec((1, tn), lambda i, j, k: (0, j)),     # bias tile
                ],
                out_specs=pl.BlockSpec((tm, tn), lambda i, j, k: (i, j)),
                scratch_shapes=[pltpu.VMEM((tm, tn), jnp.float32)],    # base accumulator
            ),
            compiler_params=pltpu.CompilerParams(
                dimension_semantics=("parallel", "parallel", "arbitrary"),
                vmem_limit_bytes=vmem_limit_bytes),
        )(x2d, w, xa, bt, bias2d)

    return out[:M, :N].reshape(*orig_shape[:-1], N)


def _reference(x2d, w, bias, lora_A, lora_B, lora_c, *, lora_alpha, r):
    base = (x2d.astype(jnp.float32) @ w.astype(jnp.float32).T
            + bias.astype(jnp.float32)).astype(x2d.dtype)
    xf = x2d.astype(jnp.float32)
    out = xf @ (lora_A * lora_c).astype(jnp.float32).T @ lora_B.astype(jnp.float32).T
    out = out * (lora_alpha / r) / r
    return base + out.astype(x2d.dtype)


if __name__ == "__main__":
    key = jax.random.PRNGKey(0)
    k_x, k_w, k_b, k_a, k_bb, k_c = jax.random.split(key, 6)

    # Small but TPU-tiling-realistic shapes: K, N multiples of 128.
    batch, seq = 2, 8
    in_features, out_features = 512, 512
    r_rank, lora_alpha = 8, 16

    x = jax.random.normal(k_x, (batch, seq, in_features), dtype=jnp.bfloat16)
    # synthetic "dequantized" base weights (GPTQ checkpoint not loaded — init in-script)
    w = (jax.random.normal(k_w, (out_features, in_features), jnp.float32) * 0.05
         ).astype(jnp.bfloat16)
    bias = (jax.random.normal(k_b, (out_features,), jnp.float32) * 0.1).astype(jnp.bfloat16)
    lora_A = jax.random.normal(k_a, (r_rank, in_features), jnp.float32) * 0.05
    lora_B = jax.random.normal(k_bb, (out_features, r_rank), jnp.float32) * 0.05
    lora_c = jax.random.normal(k_c, (r_rank, 1), jnp.float32)

    ref = _reference(x.reshape(-1, in_features), w, bias, lora_A, lora_B, lora_c,
                     lora_alpha=lora_alpha, r=r_rank
                     ).reshape(batch, seq, out_features)

    # Path 1: full-K (2-D grid, no accumulator scratch).
    out_full = l1ra_quant_linear(x, w, bias, lora_A, lora_B, lora_c,
                                 lora_alpha=lora_alpha, r=r_rank)
    out_full = jax.block_until_ready(out_full)

    # Path 2: split-K (3-D grid with f32 accumulator), forced via small tk_max.
    out_split = l1ra_quant_linear(x, w, bias, lora_A, lora_B, lora_c,
                                  lora_alpha=lora_alpha, r=r_rank, tk_max=256)
    out_split = jax.block_until_ready(out_split)

    for out in (out_full, out_split):
        assert out.shape == (batch, seq, out_features)
        assert out.dtype == x.dtype
        assert jnp.allclose(out.astype(jnp.float32), ref.astype(jnp.float32),
                            atol=1e-1, rtol=1e-1)
    print("KERNEL_OK")
</pallas_src>

<mosaic_0001>
module attributes {stable_mosaic.version = 11 : i64} {
  func.func @_l1ra_kernel_fullk(%arg0: i32, %arg1: i32, %arg2: memref<16x512xbf16, #tpu.memory_space<vmem>>, %arg3: memref<256x512xbf16, #tpu.memory_space<vmem>>, %arg4: memref<16x8xbf16, #tpu.memory_space<vmem>>, %arg5: memref<8x256xbf16, #tpu.memory_space<vmem>>, %arg6: memref<1x256xbf16, #tpu.memory_space<vmem>>, %arg7: memref<16x256xbf16, #tpu.memory_space<vmem>>) attributes {dimension_semantics = [#tpu.dimension_semantics<parallel>, #tpu.dimension_semantics<parallel>], iteration_bounds = array<i64: 1, 2>, scalar_prefetch = 0 : i64, scratch_operands = 0 : i64, tpu.core_type = #tpu.core_type<tc>, window_params = [{transform_indices = @transform_0, window_bounds = array<i64: 16, 512>}, {transform_indices = @transform_1, window_bounds = array<i64: 256, 512>}, {transform_indices = @transform_2, window_bounds = array<i64: 16, 8>}, {transform_indices = @transform_3, window_bounds = array<i64: 8, 256>}, {transform_indices = @transform_4, window_bounds = array<i64: 1, 256>}, {transform_indices = @transform_5, window_bounds = array<i64: 16, 256>}]} {
    %c0 = arith.constant 0 : index
    %c0_0 = arith.constant 0 : index
    %0 = vector.load %arg2[%c0, %c0_0] : memref<16x512xbf16, #tpu.memory_space<vmem>>, vector<16x512xbf16>
    %c0_1 = arith.constant 0 : index
    %c0_2 = arith.constant 0 : index
    %1 = vector.load %arg3[%c0_1, %c0_2] : memref<256x512xbf16, #tpu.memory_space<vmem>>, vector<256x512xbf16>
    %cst = arith.constant dense<0.000000e+00> : vector<16x256xf32>
    %2 = tpu.matmul %0, %1, %cst {dimension_numbers = #tpu.dot_dimension_numbers<[1], [1], [0], [0], [0, 0, 1, 0], [], []>} : vector<16x512xbf16>, vector<256x512xbf16>, vector<16x256xf32> -> vector<16x256xf32>
    %c0_3 = arith.constant 0 : index
    %c0_4 = arith.constant 0 : index
    %3 = vector.load %arg6[%c0_3, %c0_4] : memref<1x256xbf16, #tpu.memory_space<vmem>>, vector<1x256xbf16>
    %4 = arith.extf %3 : vector<1x256xbf16> to vector<1x256xf32>
    %5 = vector.broadcast %4 : vector<1x256xf32> to vector<16x256xf32>
    %6 = arith.addf %2, %5 : vector<16x256xf32>
    %c0_5 = arith.constant 0 : index
    %c0_6 = arith.constant 0 : index
    %7 = vector.load %arg4[%c0_5, %c0_6] : memref<16x8xbf16, #tpu.memory_space<vmem>>, vector<16x8xbf16>
    %c0_7 = arith.constant 0 : index
    %c0_8 = arith.constant 0 : index
    %8 = vector.load %arg5[%c0_7, %c0_8] : memref<8x256xbf16, #tpu.memory_space<vmem>>, vector<8x256xbf16>
    %cst_9 = arith.constant dense<0.000000e+00> : vector<16x256xf32>
    %9 = tpu.matmul %7, %8, %cst_9 {dimension_numbers = #tpu.dot_dimension_numbers<[1], [0], [0], [1], [0, 0, 1, 1], [], []>} : vector<16x8xbf16>, vector<8x256xbf16>, vector<16x256xf32> -> vector<16x256xf32>
    %10 = arith.truncf %6 : vector<16x256xf32> to vector<16x256xbf16>
    %11 = arith.truncf %9 : vector<16x256xf32> to vector<16x256xbf16>
    %12 = arith.addf %10, %11 : vector<16x256xbf16>
    %c0_10 = arith.constant 0 : index
    %c0_11 = arith.constant 0 : index
    %13 = vector.load %arg7[%c0_10, %c0_11] : memref<16x256xbf16, #tpu.memory_space<vmem>>, vector<16x256xbf16>
    tpu.vector_store %arg7[%c0_10, %c0_11], %12 {strides = array<i32>} : memref<16x256xbf16, #tpu.memory_space<vmem>>, vector<16x256xbf16>,
    return
  }
  func.func @transform_0(%arg0: i32, %arg1: i32) -> (i32, i32) {
    %c0_i32 = arith.constant 0 : i32
    %c0_i32_0 = arith.constant 0 : i32
    return %arg0, %c0_i32 : i32, i32
  }
  func.func @transform_1(%arg0: i32, %arg1: i32) -> (i32, i32) {
    %c0_i32 = arith.constant 0 : i32
    %c0_i32_0 = arith.constant 0 : i32
    return %arg1, %c0_i32 : i32, i32
  }
  func.func @transform_2(%arg0: i32, %arg1: i32) -> (i32, i32) {
    %c0_i32 = arith.constant 0 : i32
    %c0_i32_0 = arith.constant 0 : i32
    return %arg0, %c0_i32 : i32, i32
  }
  func.func @transform_3(%arg0: i32, %arg1: i32) -> (i32, i32) {
    %c0_i32 = arith.constant 0 : i32
    %c0_i32_0 = arith.constant 0 : i32
    return %c0_i32, %arg1 : i32, i32
  }
  func.func @transform_4(%arg0: i32, %arg1: i32) -> (i32, i32) {
    %c0_i32 = arith.constant 0 : i32
    %c0_i32_0 = arith.constant 0 : i32
    return %c0_i32, %arg1 : i32, i32
  }
  func.func @transform_5(%arg0: i32, %arg1: i32) -> (i32, i32) {
    %c0_i32 = arith.constant 0 : i32
    return %arg0, %arg1 : i32, i32
  }
}

</mosaic_0001>

<bundles_post_ra>
// kernel: tpu_custom_call.1
= control target key start
LH: loop header
LB: loop body
LE: loop exit
PB: predicated region body
PF: predicated region fallthrough
CT: control target
= control target key end

     0   :  { %10 = vsyncpa [#allocation3], 0  ;;  %s1884_s0 = inlined_call_operand.hbm [shape: bf16[16,512], index: 0, kind: input, shape index: {}]   ;;  %s1885_s1 = inlined_call_operand.hbm [shape: bf16[512,512], index: 1, kind: input, shape index: {}]   ;;  %s1886_s2 = inlined_call_operand.vmem [shape: bf16[16,8], index: 2, kind: input, shape index: {}]   ;;  %s1887_s3 = inlined_call_operand.vmem [shape: bf16[8,512], index: 3, kind: input, shape index: {}]   ;;  %s1888_s4 = inlined_call_operand.vmem [shape: bf16[1,512], index: 4, kind: input, shape index: {}]   ;;  %s1889_s5 = inlined_call_operand.hbm [shape: bf16[16,512], index: 5, kind: output, shape index: {}]  }
   0x1   :  { %11 = vsyncpa [#allocation6], 0 }
   0x2   :  { %13 = vsyncpa [#allocation6 + $0x1], 0 }
   0x3   :  { %14 = vsyncpa [#allocation4], 0 }
   0x4   :  { %16 = vsyncpa [#allocation4 + $0x1], 0  ;;  %s1578_s18 = smov 0   ;;  %s1580_s19 = smov 0  }
   0x5   :  { %s1582_s20 = smov 0   ;;  %s1584_s21 = smov 0  }
   0x6   :  { %s1586_s22 = smov 0   ;;  %s1588_s23 = smov 0  }
   0x7 LB: > { %s1101_s24 = sadd.s32 4294967295, %s1537_s23   ;;  %s1102_s25 = sadd.s32 4294967294, %s1537_s23   ;;  %s1537_s23 = sphi %s1588_s23, %s22_s23   ;;  %s1533_s22 = sphi %s1586_s22, %s1915_s22   ;;  %s1529_s21 = sphi %s1584_s21, %s1914_s21   ;;  %s1525_s20 = sphi %s1582_s20, %s1913_s20   ;;  %s1521_s19 = sphi %s1580_s19, %s1912_s19   ;;  %s1517_s18 = sphi %s1578_s18, %s1911_s18  }
   0x8   : > { %p80_p0 = scmp.ne.s32.totalorder %s1521_s19, %s1517_s18  ;;  %p1612_p1 = scmp.eq.s32.totalorder %s1101_s24, 0 }
   0x9   : > { %p1616_p2 = scmp.eq.s32.totalorder %s1101_s24, 1  ;;  %p190_p3 = scmp.eq.s32.totalorder %s1102_s25, 1 }
   0xa   : > { %s1895_s26 = scalar_select %p1612_p1, 1, 0 }
   0xb   : > { %s1896_s27 = scalar_select %p1616_p2, 1, 0 }
   0xc   : > { %p1622_p4 = por %p1612_p1, %p80_p0  ;;  %p1103_p5 = scmp.ge.s32.totalorder %s1537_s23, 1 }
   0xd   : > { %p1627_p6 = por %p190_p3, %p80_p0  ;;  %p197_p7 = scmp.lt.s32.totalorder %s1537_s23, 3 }
   0xe   : > { %s1897_s28 = scalar_select %p1622_p4, 1, 0 }
   0xf   : > { %s1898_s29 = scalar_select %p1627_p6, 1, 0 }
  0x10   : > { %p1632_p8 = pnand %p1103_p5, %p197_p7  ;;  %s1539_s6 = smov [#allocation2]  }
  0x11   : > { %s213_s7 = sshll.u32 %s1539_s6, 4  ;;  %s31_s9 = sadd.s32 1, %s1533_s22  ;;  %s214_s7 = int_to_ptr.vmem [resolvable:$true] %s213_s7 }
  0x12   : > { %s1899_s30 = scalar_select %p1632_p8, 1, 0 }
  0x13   : > { %p1217_p9 = pneg %p1632_p8  ;;  %s1393_s12 = scalar_lea.hbm %s1884_s0, 512 }
  0x14   : > { %p1394_p12 = scmp.ne.s32.totalorder %s1884_s0, %s1393_s12  ;;  %p1400_p5 = scmp.lt.u32.totalorder %s1393_s12, %s1884_s0 }
  0x15   : > { %p1641_p11 = pnand %p1217_p9, %p1612_p1 }
  0x17   : > { %p1395_p13 = pneg %p1641_p11 }
  0x19   : > { %p1396_p0 = pnand %p1395_p13, %p1394_p12 }
  0x1b   : > { %p1397_p3 = pneg %p1396_p0 }
  0x1d   : > { %p1402_p7 = pnand %p1400_p5, %p1397_p3 }
  0x1f   : > { %1405 = shalt.err (!%p1402_p7)
}
  0x20   : > { %s1406_s17 = scalar_lea.vmem %s214_s7, 512  ;;  %p1414_p4 = scmp.lt.s32.totalorder %s214_s7, %s214_s7 }
  0x21   : > { %p1407_p9 = scmp.ne.s32.totalorder %s214_s7, %s1406_s17  ;;  %p1415_p1 = scmp.lt.s32.totalorder %s1406_s17, %s1406_s17 }
  0x23   : > { %p1409_p10 = pnand %p1407_p9, %p1395_p13  ;;  %p1416_p8 = por %p1415_p1, %p1414_p4 }
  0x25   : > { %p1410_p6 = pneg %p1409_p10 }
  0x27   : > { %p1417_p2 = pnand %p1416_p8, %p1410_p6 }
  0x29   : > { %1420 = shalt.err (!%p1417_p2)
}
  0x2a   : > { %s1894_s24 = smov 256   ;;  %s1541_s25 = smov 16  }
  0x2b   : > { %1220 = dma.hbm_to_vmem [thread:$0]  (!%p1641_p11), %s1884_s0, 512, %s214_s7, [#allocation3], %s1894_s24, %s1894_s24, %s1541_s25  }
  0x2c   : > { %p32_p1 = scmp.ge.s32.totalorder %s31_s9, 2  ;;  %s67_s11 = sadd.s32 1, %s1525_s20 }
  0x2d   : > { %p74_p2 = scmp.ne.s32.totalorder %s1525_s20, %s1521_s19  ;;  %p75_p4 = scmp.eq.s32.totalorder %s1537_s23, 0 }
  0x2e   : > { %s1917_s9 = smov (%p32_p1, %s31_s9), 0  ;;  %p1902_p8 = scmp.ne.s32.totalorder %s1896_s27, 0 }
  0x2f   : > { %p1671_p6 = por %p75_p4, %p74_p2  ;;  %s64_s13 = ssub.s32 %s1533_s22, %s1917_s9 }
  0x30   : > { %p1677_p10 = por %p1902_p8, %p74_p2  ;;  %p1230_p12 = scmp.lt.s32.totalorder %s1537_s23, 2 }
  0x31   : > { %p65_p11 = scmp.eq.s32.totalorder %s64_s13, 0  ;;  %s236_s7 = sand.u32 1, %s1525_s20  }
  0x32   : > { %s1107_s14 = sshll.u32 %s236_s7, 9  ;;  %s1199_s16 = sshll.u32 %s1533_s22, 13 }
  0x33   : > { %s1686_s15 = scalar_select %p65_p11, %s1525_s20, %s67_s11  }
  0x34   : > { %s1692_s10 = scalar_lea.hbm %s1885_s1, %s1199_s16  ;;  %s240_s27 = scalar_lea.vmem [#allocation5], %s1107_s14 }
  0x35   : > { %s248_s24 = sshll.u32 %s240_s27, 4  ;;  %p1698_p13 = pnand %p1230_p12, %p1671_p6  ;;  %s1694_s24 = int_to_ptr.vmem [resolvable:$true] %s248_s24 }
  0x36   : > { %s1702_s11 = scalar_lea.sflag [#allocation6], %s236_s7  ;;  %s1421_s17 = scalar_lea.hbm %s1692_s10, 8192 }
  0x37   : > { %p1422_p0 = scmp.ne.s32.totalorder %s1692_s10, %s1421_s17  ;;  %p1423_p3 = pneg %p1698_p13 }
  0x38   : > { %s1426_s12 = scalar_lea.hbm %s1885_s1, 16384  ;;  %p1427_p9 = scmp.lt.u32.totalorder %s1692_s10, %s1885_s1 }
  0x39   : > { %p1424_p5 = pnand %p1423_p3, %p1422_p0  ;;  %p1428_p1 = scmp.lt.u32.totalorder %s1426_s12, %s1421_s17 }
  0x3a   : > { %p1430_p4 = scmp.lt.u32.totalorder %s1421_s17, %s1692_s10 }
  0x3b   : > { %p1425_p7 = pneg %p1424_p5  ;;  %p1429_p2 = por %p1428_p1, %p1427_p9 }
  0x3d   : > { %p1431_p6 = por %p1430_p4, %p1429_p2 }
  0x3f   : > { %p1432_p8 = pnand %p1431_p6, %p1425_p7 }
  0x41   : > { %1435 = shalt.err (!%p1432_p8)
}
  0x42   : > { %s1436_s7 = scalar_lea.vmem %s1694_s24, 8192  ;;  %s1542_s14 = smov [#allocation5]  }
  0x43   : > { %p1437_p12 = scmp.ne.s32.totalorder %s1694_s24, %s1436_s7  ;;  %s1441_s16 = sshll.u32 %s1542_s14, 4  ;;  %s1442_s16 = int_to_ptr.vmem [resolvable:$false] %s1441_s16 }
  0x44   : > { %s1443_s6 = scalar_lea.vmem %s1442_s16, 16384  ;;  %p1444_p5 = scmp.lt.s32.totalorder %s1694_s24, %s1442_s16 }
  0x45   : > { %p1439_p11 = pnand %p1437_p12, %p1423_p3  ;;  %p1445_p9 = scmp.lt.s32.totalorder %s1443_s6, %s1436_s7 }
  0x47   : > { %p1440_p0 = pneg %p1439_p11  ;;  %p1446_p1 = por %p1445_p9, %p1444_p5 }
  0x49   : > { %p1447_p2 = pnand %p1446_p1, %p1440_p0 }
  0x4b   : > { %1450 = shalt.err (!%p1447_p2)
}
  0x4c   : > { %s1905_s17 = smov 256   ;;  %p1906_p3 = scmp.ne.s32.totalorder %s1899_s30, 0 }
  0x4d   : > { %1224 = dma.hbm_to_vmem [thread:$0]  (!%p1698_p13), %s1692_s10, 8192, %s1694_s24, %s1702_s11, %s1905_s17, %s1905_s17, %s1541_s25  }
  0x4e   : > { %277 = sbr.rel (%p1906_p3) target bundleno = 464 (0x1d0), region = 40  ;;  %p1907_p7 = scmp.ne.s32.totalorder (!%p1906_p3), %s1895_s26, 0 }
  0x55   : > { %1504 = dma.done.wait (%p1907_p7), [#allocation3], 512  }
  0x56   : > { %1506 = vsyncadd (%p1907_p7), [#allocation3], 4294966784  ;;  %s1740_s12 = sand.u32 1, %s1521_s19   ;;  %p1908_p13 = scmp.ne.s32.totalorder %s1897_s28, 0 }
  0x57   : > { %s1113_s13 = sshll.u32 %s1740_s12, 9  ;;  %s284_s27 = scalar_lea.sflag [#allocation6], %s1740_s12 }
  0x58   : > { %s1744_s7 = scalar_lea.vmem [#allocation5], %s1113_s13 }
  0x59   : > { %1508 = dma.done.wait (%p1908_p13), %s284_s27, 8192  }
  0x5a   : > { %1510 = vsyncadd (%p1908_p13), %s284_s27, 4294959104  ;;  %v1288_v0 = vld [vmem:[%s1744_s7 + $0x4] ss:$16 sps:$4 sm:$0xff]   ;;  %v1290_v1 = vld [vmem:[%s1744_s7] ss:$16 sps:$4 sm:$0xff]   ;;  %s1115_s26 = sshll.u32 %s1529_s21, 1 }
  0x5b   : > { %779 = vmatprep.subr.bf16.mxu1 %v1288_v0  ;;  %v1291_v2 = vld [vmem:[%s1744_s7 + $0xc] ss:$16 sps:$4 sm:$0xff]   ;;  %v1293_v3 = vld [vmem:[%s1744_s7 + $0x8] ss:$16 sps:$4 sm:$0xff]   ;;  %v1294_v4 = vld [vmem:[%s1744_s7 + $0x24] ss:$16 sps:$4 sm:$0xff]  }
  0x5c   : > { %780 = vmatpush1.bf16.xpose.msra.mxu1 %v1290_v1  ;;  %822 = vmatprep.subr.bf16.mxu0 %v1291_v2  ;;  %v1297_v5 = vld [vmem:[%s1744_s7 + $0x2c] ss:$16 sps:$4 sm:$0xff]   ;;  %v1296_v6 = vld [vmem:[%s1744_s7 + $0x20] ss:$16 sps:$4 sm:$0xff]   ;;  %v1300_v7 = vld [vmem:[%s1744_s7 + $0x44] ss:$16 sps:$4 sm:$0xff]  }
  0x5d   : > { %823 = vmatpush1.bf16.xpose.msra.mxu0 %v1293_v3  ;;  %781 = vmatprep.subr.bf16.mxu1 %v1294_v4  ;;  %v1299_v8 = vld [vmem:[%s1744_s7 + $0x28] ss:$16 sps:$4 sm:$0xff]   ;;  %v1303_v9 = vld [vmem:[%s1744_s7 + $0x4c] ss:$16 sps:$4 sm:$0xff]   ;;  %v1302_v10 = vld [vmem:[%s1744_s7 + $0x40] ss:$16 sps:$4 sm:$0xff]  }
  0x5e   : > { %824 = vmatprep.subr.bf16.mxu0 %v1297_v5  ;;  %v1306_v11 = vld [vmem:[%s1744_s7 + $0x64] ss:$16 sps:$4 sm:$0xff]   ;;  %v1305_v12 = vld [vmem:[%s1744_s7 + $0x48] ss:$16 sps:$4 sm:$0xff]   ;;  %v1309_v13 = vld [vmem:[%s1744_s7 + $0x6c] ss:$16 sps:$4 sm:$0xff]  }
  0x5f   : > { %v1308_v14 = vld [vmem:[%s1744_s7 + $0x60] ss:$16 sps:$4 sm:$0xff]   ;;  %v1312_v15 = vld [vmem:[%s1744_s7 + $0x84] ss:$16 sps:$4 sm:$0xff]   ;;  %v1311_v16 = vld [vmem:[%s1744_s7 + $0x68] ss:$16 sps:$4 sm:$0xff]  }
  0x60   : > { %v1315_v17 = vld [vmem:[%s1744_s7 + $0x8c] ss:$16 sps:$4 sm:$0xff]   ;;  %v1314_v18 = vld [vmem:[%s1744_s7 + $0x80] ss:$16 sps:$4 sm:$0xff]   ;;  %v1318_v19 = vld [vmem:[%s1744_s7 + $0xa4] ss:$16 sps:$4 sm:$0xff]  }
  0x61   : > { %v1317_v20 = vld [vmem:[%s1744_s7 + $0x88] ss:$16 sps:$4 sm:$0xff]   ;;  %v1321_v21 = vld [vmem:[%s1744_s7 + $0xac] ss:$16 sps:$4 sm:$0xff]   ;;  %v1320_v22 = vld [vmem:[%s1744_s7 + $0xa0] ss:$16 sps:$4 sm:$0xff]  }
  0x62   : > { %v1324_v23 = vld [vmem:[%s1744_s7 + $0xc4] ss:$16 sps:$4 sm:$0xff]   ;;  %v1323_v24 = vld [vmem:[%s1744_s7 + $0xa8] ss:$16 sps:$4 sm:$0xff]   ;;  %v1327_v25 = vld [vmem:[%s1744_s7 + $0xcc] ss:$16 sps:$4 sm:$0xff]  }
  0x63   : > { %v1386_v26 = vld [vmem:[#allocation2 + $0x4] ss:$16 sps:$4 sm:$0xff]   ;;  %v1390_v27 = vld [vmem:[#allocation2 + $0xc] ss:$16 sps:$4 sm:$0xff]   ;;  %v1326_v28 = vld [vmem:[%s1744_s7 + $0xc0] ss:$16 sps:$4 sm:$0xff]  }
  0x64   : > { %782 = vmatpush1.bf16.xpose.msra.mxu1 %v1296_v6  ;;  %811 = vmatprep.mubr.bf16.mxu1 %v1386_v26  ;;  %v1330_v29 = vld [vmem:[%s1744_s7 + $0xe4] ss:$16 sps:$4 sm:$0xff]   ;;  %v1329_v30 = vld [vmem:[%s1744_s7 + $0xc8] ss:$16 sps:$4 sm:$0xff]   ;;  %v1333_v31 = vld [vmem:[%s1744_s7 + $0xec] ss:$16 sps:$4 sm:$0xff]  }
  0x65   : > { %783 = vmatprep.subr.bf16.mxu1 %v1300_v7  ;;  %825 = vmatpush1.bf16.xpose.msra.mxu0 %v1299_v8  ;;  %v1332_v32 = vld [vmem:[%s1744_s7 + $0xe0] ss:$16 sps:$4 sm:$0xff]   ;;  %v1336_v33 = vld [vmem:[%s1744_s7 + $0x104] ss:$16 sps:$4 sm:$0xff]   ;;  %v1335_v34 = vld [vmem:[%s1744_s7 + $0xe8] ss:$16 sps:$4 sm:$0xff]  }
  0x66   : > { %826 = vmatprep.subr.bf16.mxu0 %v1303_v9  ;;  %854 = vmatprep.mubr.bf16.mxu0 %v1390_v27  ;;  %v1339_v35 = vld [vmem:[%s1744_s7 + $0x10c] ss:$16 sps:$4 sm:$0xff]   ;;  %v1338_v36 = vld [vmem:[%s1744_s7 + $0x100] ss:$16 sps:$4 sm:$0xff]   ;;  %v1342_v37 = vld [vmem:[%s1744_s7 + $0x124] ss:$16 sps:$4 sm:$0xff]  }
  0x67   : > { %v1341_v38 = vld [vmem:[%s1744_s7 + $0x108] ss:$16 sps:$4 sm:$0xff]   ;;  %v1345_v39 = vld [vmem:[%s1744_s7 + $0x12c] ss:$16 sps:$4 sm:$0xff]   ;;  %v1344_v40 = vld [vmem:[%s1744_s7 + $0x120] ss:$16 sps:$4 sm:$0xff]  }
  0x68   : > { %v1348_v41 = vld [vmem:[%s1744_s7 + $0x144] ss:$16 sps:$4 sm:$0xff]   ;;  %v1347_v42 = vld [vmem:[%s1744_s7 + $0x128] ss:$16 sps:$4 sm:$0xff]   ;;  %v1351_v43 = vld [vmem:[%s1744_s7 + $0x14c] ss:$16 sps:$4 sm:$0xff]  }
  0x69   : > { %v1350_v44 = vld [vmem:[%s1744_s7 + $0x140] ss:$16 sps:$4 sm:$0xff]   ;;  %v1354_v45 = vld [vmem:[%s1744_s7 + $0x164] ss:$16 sps:$4 sm:$0xff]   ;;  %v1353_v46 = vld [vmem:[%s1744_s7 + $0x148] ss:$16 sps:$4 sm:$0xff]  }
  0x6a   : > { %v1357_v47 = vld [vmem:[%s1744_s7 + $0x16c] ss:$16 sps:$4 sm:$0xff]   ;;  %v1356_v48 = vld [vmem:[%s1744_s7 + $0x160] ss:$16 sps:$4 sm:$0xff]   ;;  %v1360_v49 = vld [vmem:[%s1744_s7 + $0x184] ss:$16 sps:$4 sm:$0xff]  }
  0x6b   : > { %v1359_v50 = vld [vmem:[%s1744_s7 + $0x168] ss:$16 sps:$4 sm:$0xff]   ;;  %v1363_v51 = vld [vmem:[%s1744_s7 + $0x18c] ss:$16 sps:$4 sm:$0xff]   ;;  %v1362_v52 = vld [vmem:[%s1744_s7 + $0x180] ss:$16 sps:$4 sm:$0xff]  }
  0x6c   : > { %784 = vmatpush1.bf16.xpose.msra.mxu1 %v1302_v10  ;;  %v1366_v53 = vld [vmem:[%s1744_s7 + $0x1a4] ss:$16 sps:$4 sm:$0xff]   ;;  %v1365_v54 = vld [vmem:[%s1744_s7 + $0x188] ss:$16 sps:$4 sm:$0xff]   ;;  %v1369_v55 = vld [vmem:[%s1744_s7 + $0x1ac] ss:$16 sps:$4 sm:$0xff]   ;;  %v421_v10 = vlaneseq }
  0x6d   : > { %785 = vmatprep.subr.bf16.mxu1 %v1306_v11  ;;  %827 = vmatpush1.bf16.xpose.msra.mxu0 %v1305_v12  ;;  %v1368_v56 = vld [vmem:[%s1744_s7 + $0x1a0] ss:$16 sps:$4 sm:$0xff]   ;;  %p337_p4 = scmp.lt.s32.totalorder %s1115_s26, 3  ;;  %v1372_v57 = vld [vmem:[%s1744_s7 + $0x1c4] ss:$16 sps:$4 sm:$0xff]   ;;  %vm882_vm0 = vcmask 1043456  }
  0x6e   : > { %828 = vmatprep.subr.bf16.mxu0 %v1309_v13  ;;  %v1371_v58 = vld [vmem:[%s1744_s7 + $0x1a8] ss:$16 sps:$4 sm:$0xff]   ;;  %v1375_v59 = vld [vmem:[%s1744_s7 + $0x1cc] ss:$16 sps:$4 sm:$0xff]   ;;  %v1374_v60 = vld [vmem:[%s1744_s7 + $0x1c0] ss:$16 sps:$4 sm:$0xff]  }
  0x6f   : > { %s1919_s26 = smov (!%p337_p4, %s1115_s26), 3  ;;  %v1378_v61 = vld [vmem:[%s1744_s7 + $0x1e4] ss:$16 sps:$4 sm:$0xff]   ;;  %v1377_v62 = vld [vmem:[%s1744_s7 + $0x1c8] ss:$16 sps:$4 sm:$0xff]   ;;  %v1543_v8 = vmov 0  }
  0x70   : > { %s1116_s28 = sshll.u32 %s1919_s26, 2  ;;  %v1381_v63 = vld [vmem:[%s1744_s7 + $0x1ec] ss:$16 sps:$4 sm:$0xff]   ;;  %v1380_v1 = vld [vmem:[%s1744_s7 + $0x1e0] ss:$16 sps:$4 sm:$0xff]   ;;  %vm878_vm1 = vcmask 64512   ;;  %s345_s6 = scalar_lea.vmem %s1888_s4, %s1919_s26 }
  0x71   : > { %s340_s25 = scalar_lea.vmem %s1887_s3, %s1116_s28  ;;  %v1383_v3 = vld [vmem:[%s1744_s7 + $0x1e8] ss:$16 sps:$4 sm:$0xff]   ;;  %v1384_v5 = vld [vmem:[#allocation2] ss:$16 sps:$4 sm:$0xff]   ;;  %v422_v11 = vshrl.u32 %v421_v10, 7  ;;  %s1114_s17 = sshll.u32 %s1740_s12, 4 }
  0x72   : > { %v867_v0 = vld [vmem:[%s340_s25] sm:$0xff]  ;;  %v1388_v6 = vld [vmem:[#allocation2 + $0x8] ss:$16 sps:$4 sm:$0xff]   ;;  %s327_s13 = scalar_lea.vmem [#allocation7], %s1114_s17  ;;  %s1200_s7 = sshll.u32 %s1529_s21, 7 }
  0x73   : > { %v1188_v2 = vcombine.high %v867_v0, %v867_v0  ;;  %v1187_v4 = vcombine.low %v867_v0, %v867_v0  ;;  %v1392_v9 = vld [vmem:[%s1886_s2] sm:$0xff]   ;;  %s967_s27 = sshll.u32 %s327_s13, 4  ;;  %s1835_s30 = scalar_lea.hbm %s1889_s5, %s1200_s7  ;;  %s1830_s27 = int_to_ptr.vmem [resolvable:$true] %s967_s27 }
  0x74   : > { %786 = vmatpush1.bf16.xpose.msra.mxu1 %v1308_v14  ;;  %v418_v12 = vld [vmem:[%s345_s6] sm:$0x3]  ;;  %v423_v14 = vsub.s32 0, %v422_v11  ;;  %s951_s24 = scalar_lea.sflag [#allocation4], %s1740_s12  ;;  %s1451_s25 = scalar_lea.vmem %s1830_s27, 256 }
  0x75   : > { %787 = vmatprep.subr.bf16.mxu1 %v1312_v15  ;;  %829 = vmatpush1.bf16.xpose.msra.mxu0 %v1311_v16  ;;  %v884_v7 = vsel %vm882_vm0, %v1187_v4, 0  ;;  %v419_v13 = vunpack.c.l.bf16 %v418_v12  ;;  %v427_v15 = vsub.s32 2, %v422_v11  ;;  %p1452_p6 = scmp.ne.s32.totalorder %s1830_s27, %s1451_s25  ;;  %s1544_s21 = smov [#allocation7]  }
  0x76   : > { %830 = vmatprep.subr.bf16.mxu0 %v1315_v17  ;;  %s1455_s10 = sshll.u32 %s1544_s21, 4  ;;  %s1456_s10 = int_to_ptr.vmem [resolvable:$false] %s1455_s10 }
  0x77   : > { %v424_v16 = vrot.slane %v419_v13, %v423_v14  ;;  %v428_v17 = vrot.slane %v419_v13, %v427_v15  ;;  %p1453_p8 = pnand %p1452_p6, %p1677_p10  ;;  %s1457_s11 = scalar_lea.vmem %s1456_s10, 512 }
  0x78   : > { %p1458_p11 = scmp.lt.s32.totalorder %s1830_s27, %s1456_s10  ;;  %p1459_p0 = scmp.lt.s32.totalorder %s1457_s11, %s1451_s25 }
  0x79   : > { %p1454_p12 = pneg %p1453_p8 }
  0x7a   : > { %p1460_p5 = por %p1459_p0, %p1458_p11 }
  0x7c   : > { %788 = vmatpush1.bf16.xpose.msra.mxu1 %v1314_v18  ;;  %v434_v18 = vrot.slane %v424_v16, %v423_v14  ;;  %p1461_p9 = pnand %p1460_p5, %p1454_p12 }
  0x7d   : > { %789 = vmatprep.subr.bf16.mxu1 %v1318_v19  ;;  %831 = vmatpush1.bf16.xpose.msra.mxu0 %v1317_v20  ;;  %v438_v19 = vrot.slane %v428_v17, %v423_v14 }
  0x7e   : > { %832 = vmatprep.subr.bf16.mxu0 %v1321_v21 }
  0x84   : > { %790 = vmatpush1.bf16.xpose.msra.mxu1 %v1320_v22 }
  0x85   : > { %791 = vmatprep.subr.bf16.mxu1 %v1324_v23  ;;  %833 = vmatpush1.bf16.xpose.msra.mxu0 %v1323_v24 }
  0x86   : > { %834 = vmatprep.subr.bf16.mxu0 %v1327_v25 }
  0x8c   : > { %792 = vmatpush1.bf16.xpose.msra.mxu1 %v1326_v28 }
  0x8d   : > { %793 = vmatprep.subr.bf16.mxu1 %v1330_v29  ;;  %835 = vmatpush1.bf16.xpose.msra.mxu0 %v1329_v30 }
  0x8e   : > { %836 = vmatprep.subr.bf16.mxu0 %v1333_v31 }
  0x94   : > { %794 = vmatpush1.bf16.xpose.msra.mxu1 %v1332_v32 }
  0x95   : > { %795 = vmatprep.subr.bf16.mxu1 %v1336_v33  ;;  %837 = vmatpush1.bf16.xpose.msra.mxu0 %v1335_v34 }
  0x96   : > { %838 = vmatprep.subr.bf16.mxu0 %v1339_v35 }
  0x9c   : > { %796 = vmatpush1.bf16.xpose.msra.mxu1 %v1338_v36 }
  0x9d   : > { %797 = vmatprep.subr.bf16.mxu1 %v1342_v37  ;;  %839 = vmatpush1.bf16.xpose.msra.mxu0 %v1341_v38 }
  0x9e   : > { %840 = vmatprep.subr.bf16.mxu0 %v1345_v39 }
  0xa4   : > { %798 = vmatpush1.bf16.xpose.msra.mxu1 %v1344_v40 }
  0xa5   : > { %799 = vmatprep.subr.bf16.mxu1 %v1348_v41  ;;  %841 = vmatpush1.bf16.xpose.msra.mxu0 %v1347_v42 }
  0xa6   : > { %842 = vmatprep.subr.bf16.mxu0 %v1351_v43 }
  0xac   : > { %800 = vmatpush1.bf16.xpose.msra.mxu1 %v1350_v44 }
  0xad   : > { %801 = vmatprep.subr.bf16.mxu1 %v1354_v45  ;;  %843 = vmatpush1.bf16.xpose.msra.mxu0 %v1353_v46 }
  0xae   : > { %844 = vmatprep.subr.bf16.mxu0 %v1357_v47 }
  0xb4   : > { %802 = vmatpush1.bf16.xpose.msra.mxu1 %v1356_v48 }
  0xb5   : > { %803 = vmatprep.subr.bf16.mxu1 %v1360_v49  ;;  %845 = vmatpush1.bf16.xpose.msra.mxu0 %v1359_v50 }
  0xb6   : > { %846 = vmatprep.subr.bf16.mxu0 %v1363_v51 }
  0xbc   : > { %804 = vmatpush1.bf16.xpose.msra.mxu1 %v1362_v52 }
  0xbd   : > { %805 = vmatprep.subr.bf16.mxu1 %v1366_v53  ;;  %847 = vmatpush1.bf16.xpose.msra.mxu0 %v1365_v54 }
  0xbe   : > { %848 = vmatprep.subr.bf16.mxu0 %v1369_v55 }
  0xc4   : > { %806 = vmatpush1.bf16.xpose.msra.mxu1 %v1368_v56 }
  0xc5   : > { %807 = vmatprep.subr.bf16.mxu1 %v1372_v57  ;;  %849 = vmatpush1.bf16.xpose.msra.mxu0 %v1371_v58 }
  0xc6   : > { %850 = vmatprep.subr.bf16.mxu0 %v1375_v59 }
  0xcc   : > { %808 = vmatpush1.bf16.xpose.msra.mxu1 %v1374_v60 }
  0xcd   : > { %809 = vmatprep.subr.bf16.mxu1 %v1378_v61  ;;  %851 = vmatpush1.bf16.xpose.msra.mxu0 %v1377_v62 }
  0xce   : > { %852 = vmatprep.subr.bf16.mxu0 %v1381_v63 }
  0xd4   : > { %810 = vmatpush1.bf16.xpose.msra.mxu1 %v1380_v1 }
  0xd5   : > { %1189 = vmatprep.subr.msk.bf16.mxu1 %vm882_vm0, %v1188_v2  ;;  %853 = vmatpush1.bf16.xpose.msra.mxu0 %v1383_v3 }
  0xdb   : > { %812 = vmatmul.mubr.bf16.vlgmr.msra.gmra.mrb[0].mxu1 %v1384_v5 }
  0xdc   : > { %890 = vmatpush1.bf16.msra.mxu1 %v884_v7  ;;  %921 = vmatprep.mubr.bf16.mxu1 %v1543_v8 }
  0xdd   : > { %855 = vmatmul.mubr.bf16.vlgmr.msra.gmra.mrb[0].mxu0 %v1388_v6 }
  0xe3   : > { %1190 = vmatmul.mubr.msk.bf16.vlgmr.msra.gmra.mrb[4].mxu1 %vm878_vm1, %v1392_v9 }
 0x1ae   : > { %v813_v20 = vpop.f32.mrb[0].mxu1 }
 0x1af   : > { %v814_v21 = vadd.f32 %v813_v20, %v434_v18  ;;  %v815_v22 = vpop.f32.mrb[1].mxu1 }
 0x1b0   : > { %v816_v23 = vadd.f32 %v815_v22, %v438_v19  ;;  %v817_v24 = vpop.f32.mrb[2].mxu1  ;;  %v856_v25 = vpop.f32.mrb[0].mxu0 }
 0x1b1   : > { %v818_v26 = vadd.f32 %v817_v24, %v434_v18  ;;  %v857_v27 = vadd.f32 %v856_v25, %v814_v21  ;;  %v819_v28 = vpop.f32.mrb[3].mxu1  ;;  %v858_v29 = vpop.f32.mrb[1].mxu0 }
 0x1b2   : > { %v820_v30 = vadd.f32 %v819_v28, %v438_v19  ;;  %v859_v31 = vadd.f32 %v858_v29, %v816_v23  ;;  %v860_v32 = vpop.f32.mrb[2].mxu0 }
 0x1b3   : > { %v861_v33 = vadd.f32 %v860_v32, %v818_v26  ;;  %v862_v34 = vpop.f32.mrb[3].mxu0 }
 0x1b4   : > { %v863_v35 = vadd.f32 %v862_v34, %v820_v30 }
 0x1b5   : > { %v932_v36 = vpack.c.bf16 %v861_v33, %v857_v27 }
 0x1b6   : > { %v933_v37 = vpack.c.bf16 %v863_v35, %v859_v31  ;;  %v923_v38 = vpop.f32.mrb[4].mxu1 }
 0x1b7   : > { %v925_v39 = vpop.f32.mrb[5].mxu1 }
 0x1b8   : > { %v927_v40 = vpop.f32.mrb[6].mxu1 }
 0x1b9   : > { %v934_v41 = vpack.c.bf16 %v927_v40, %v923_v38  ;;  %v929_v42 = vpop.f32.mrb[7].mxu1 }
 0x1ba   : > { %v935_v43 = vpack.c.bf16 %v929_v42, %v925_v39 }
 0x1bb   : > { %v936_v44 = vadd.bf16 %v934_v41, %v932_v36 }
 0x1bc   : > { %v937_v45 = vadd.bf16 %v935_v43, %v933_v37 }
 0x1be   : > { %v1191_v46 = vcombine.low %v936_v44, %v937_v45  ;;  %v1192_v47 = vcombine.high %v936_v44, %v937_v45 }
 0x1c0   : > { %948 = vst [vmem:[%s327_s13] sm:$0xff] %v1191_v46  ;;  %949 = vst [vmem:[%s327_s13 + $0x8] sm:$0xff] %v1192_v47 }
 0x1c1   : > { %1464 = shalt.err (!%p1461_p9)
}
 0x1c2   : > { %s1465_s14 = scalar_lea.hbm %s1835_s30, 256  ;;  %s1469_s17 = scalar_lea.hbm %s1889_s5, 512 }
 0x1c3   : > { %p1466_p1 = scmp.ne.s32.totalorder %s1835_s30, %s1465_s14  ;;  %p1470_p7 = scmp.lt.u32.totalorder %s1835_s30, %s1889_s5 }
 0x1c4   : > { %p1471_p13 = scmp.lt.u32.totalorder %s1469_s17, %s1465_s14  ;;  %p1473_p6 = scmp.lt.u32.totalorder %s1465_s14, %s1835_s30 }
 0x1c5   : > { %p1467_p2 = pnand %p1466_p1, %p1677_p10 }
 0x1c6   : > { %p1472_p4 = por %p1471_p13, %p1470_p7 }
 0x1c7   : > { %p1468_p3 = pneg %p1467_p2 }
 0x1c8   : > { %p1474_p8 = por %p1473_p6, %p1472_p4 }
 0x1ca   : > { %p1475_p12 = pnand %p1474_p8, %p1468_p3 }
 0x1cc   : > { %1478 = shalt.err (!%p1475_p12)
}
 0x1cd   : > { %s1545_s26 = smov 128   ;;  %s1546_s28 = smov 256  }
 0x1ce   : > { %s1547_s25 = smov 8  }
 0x1cf   : > { %1215 = dma.vmem_to_hbm [thread:$0]  (%p1677_p10), %s1830_s27, 256, %s1835_s30, %s951_s24, %s1545_s26, %s1546_s28, %s1547_s25  }
 0x1d0 PF: > { %s982_s21 = sand.u32 1, %s1517_s18   ;;  %p1909_p11 = scmp.ne.s32.totalorder %s1898_s29, 0 }
 0x1d1   : > { %p1910_p0 = scmp.ge.s32.totalorder %s1537_s23, 2  ;;  %s983_s10 = scalar_lea.sflag [#allocation4], %s982_s21 }
 0x1d3   : > { %p1226_p5 = pnand %p1910_p0, %p1909_p11 }
 0x1d5   : > { %1512 = dma.done.wait (!%p1226_p5), %s983_s10, 256  }
 0x1d6   : > { %1514 = vsyncadd (!%p1226_p5), %s983_s10, 4294967040  ;;  %s22_s23 = sadd.s32 1, %s1537_s23   ;;  %s1911_s18 = smov %s1521_s19 }
 0x1d7   : > { %p19_p9 = scmp.ge.s32.totalorder %s22_s23, 4   ;;  %s1912_s19 = smov %s1525_s20 }
 0x1d8   : > { %s1913_s20 = smov %s1686_s15  ;;  %s1914_s21 = smov %s1533_s22 }
 0x1d9   : > { %s1915_s22 = smov %s1917_s9  ;;  %21 = sbr.rel (!%p19_p9) target bundleno = 7 (0x7), region = 100 }
 0x1e0   :  { %988 = vsyncpa [#allocation3], 1 }
 0x1e1   :  { %990 = vsyncpa [#allocation3 + $0x1], 1 }
 0x1e2   :  { %991 = vsyncpa [#allocation6], 1 }
 0x1e3   :  { %993 = vsyncpa [#allocation6 + $0x1], 1 }
 0x1e4   :  { %994 = vsyncpa [#allocation4], 1 }
 0x1e5   :  { %996 = vsyncpa [#allocation4 + $0x1], 1 }

</bundles_post_ra>
